<compile_context>
chip_gen: v6e
topology: v6e:2x2x1
jax: 0.10.0
libtpu: 0.0.40
codegen_flags: <defaults>
</compile_context>

<pallas_src>
import functools
import math

import jax
import jax.numpy as jnp
from jax import lax
from jax.experimental import pallas as pl
from jax.experimental.pallas import tpu as pltpu

_MASK_VALUE = -1e30   # finite "minus infinity" keeps the online softmax NaN-free


# --------------------------------------------------------------------------
# Hardware introspection (generation-aware tiling / VMEM budget).
# --------------------------------------------------------------------------
def _vmem_capacity_bytes():
    try:
        info = pltpu.get_tpu_info()
        cap = getattr(info, "vmem_capacity_bytes", None)
        if cap:
            return int(cap)
    except Exception:
        pass
    try:
        kind = jax.devices()[0].device_kind.lower()
        if any(g in kind for g in ("v4", "v5", "v6")):
            return 128 * 1024 * 1024
    except Exception:
        pass
    return 64 * 1024 * 1024        # conservative (v7x per-TC VMEM)


def _supports_bf16_vector_math():
    """bf16 VPU/EUP exists on v6e/v7x, not on v5e and earlier."""
    try:
        kind = jax.devices()[0].device_kind.lower()
        return not any(g in kind for g in ("v2", "v3", "v4", "v5"))
    except Exception:
        return False


# --------------------------------------------------------------------------
# In-kernel RoPE helpers (VPU/XLU only -- keeps the MXU free for matmuls).
# --------------------------------------------------------------------------
def _pair_swap(t, lane_even):
    """[x0,x1,x2,x3,...] -> [x1,x0,x3,x2,...] along the last axis."""
    if t.shape[-1] % 128 == 0:
        # Lane rotates on the XLU (otherwise-idle slot while the MXU runs).
        left = pltpu.roll(t, -1, axis=1)    # left[j]  = t[j+1]
        right = pltpu.roll(t, 1, axis=1)    # right[j] = t[j-1]
    else:
        left = jnp.concatenate([t[:, 1:], t[:, :1]], axis=-1)
        right = jnp.concatenate([t[:, -1:], t[:, :-1]], axis=-1)
    return jnp.where(lane_even, left, right)


def _rope(t, cos_t, sin_t, lane_even):
    """Interleaved (torch view_as_complex) rotary embedding.

    cos_t = [c0,c0,c1,c1,...],  sin_t = [-s0,s0,-s1,s1,...]  so that
      out[2i]   = t[2i]*c_i - t[2i+1]*s_i
      out[2i+1] = t[2i]*s_i + t[2i+1]*c_i
    """
    return t * cos_t + _pair_swap(t, lane_even) * sin_t


# --------------------------------------------------------------------------
# Kernel 1: Q/K/V projections + RoPE (RoPE only on Q and K; V pass-through).
# --------------------------------------------------------------------------
def qkv_rope_kernel(x_ref, wq_ref, wkv_ref, cq_ref, sq_ref, ck_ref, sk_ref,
                    q_ref, k_ref, v_ref):
    d = pl.program_id(2)                    # Q-projection column-slab index
    x = x_ref[0]                            # (ts, D), compute dtype
    head_dim = ck_ref.shape[1]

    # Q projection for this column slab (full-D contraction on the MXU).
    q = jnp.dot(x, wq_ref[...], preferred_element_type=jnp.float32)   # (ts, tdq)
    lane_even_q = (lax.broadcasted_iota(jnp.int32, q.shape, 1) % 2) == 0
    # 1/sqrt(head_dim) is folded into the Q tables.
    q_ref[0] = _rope(q, cq_ref[...], sq_ref[...], lane_even_q).astype(q_ref.dtype)

    # K and V once per (batch, seq) tile: one packed (D, 2*Dh) matmul, RoPE on
    # the K half only, V copied through untouched.
    @pl.when(d == 0)
    def _kv():
        kv = jnp.dot(x, wkv_ref[...], preferred_element_type=jnp.float32)  # (ts, 2*Dh)
        k = kv[:, :head_dim]
        v = kv[:, head_dim:]
        lane_even_k = (lax.broadcasted_iota(jnp.int32, k.shape, 1) % 2) == 0
        k_ref[0] = _rope(k, ck_ref[...], sk_ref[...], lane_even_k).astype(k_ref.dtype)
        v_ref[0] = v.astype(v_ref.dtype)


# --------------------------------------------------------------------------
# Kernel 2: flash-style MQA attention (all heads batched, online softmax).
# --------------------------------------------------------------------------
def mqa_attn_kernel(q_ref, k_ref, v_ref, o_ref, m_sc, l_sc, acc_sc, *,
                    nhead, is_causal, exp_dtype):
    qi = pl.program_id(1)
    ki = pl.program_id(2)
    n_kv = pl.num_programs(2)
    rows = q_ref.shape[1]                   # tq * nhead
    tq = rows // nhead
    tk = k_ref.shape[1]
    lane_w = m_sc.shape[-1]                 # 128 (lane-dense) or 1

    @pl.when(ki == 0)
    def _init():
        m_sc[...] = jnp.full(m_sc.shape, _MASK_VALUE, jnp.float32)
        l_sc[...] = jnp.zeros(l_sc.shape, jnp.float32)
        acc_sc[...] = jnp.zeros(acc_sc.shape, jnp.float32)

    def _make_accumulate(apply_mask):
        def _accumulate():
            q = q_ref[0]                    # (rows, Dh), pre-scaled by 1/sqrt(Dh)
            k = k_ref[0]                    # (tk, Dh)
            v = v_ref[0]                    # (tk, Dh)
            # One batched score matmul for every head (MQA: K/V shared).
            s = lax.dot_general(q, k, (((1,), (1,)), ((), ())),
                                preferred_element_type=jnp.float32)    # (rows, tk)
            if apply_mask:
                # Thin iotas + broadcasting; only runs on diagonal tiles.
                q_pos = (qi * tq +
                         lax.broadcasted_iota(jnp.int32, (rows, 1), 0) // nhead)
                k_pos = ki * tk + lax.broadcasted_iota(jnp.int32, (1, tk), 1)
                s = jnp.where(k_pos <= q_pos, s, _MASK_VALUE)
            m_prev = m_sc[...]                                       # (rows, lane_w)
            s_max = jnp.max(s, axis=-1, keepdims=True)               # (rows, 1)
            m_new = jnp.maximum(m_prev, s_max)                       # (rows, lane_w)
            m_row = m_new if lane_w == 1 else jnp.max(m_new, axis=-1, keepdims=True)
            alpha = jnp.exp(m_prev - m_new)                          # f32
            # bf16 exponent on v6e/v7x (p feeds a bf16 PV matmul anyway);
            # the denominator accumulation stays in f32.
            p = jnp.exp((s - m_row).astype(exp_dtype))
            l_sc[...] = alpha * l_sc[...] + jnp.sum(p, axis=-1, keepdims=True,
                                                    dtype=jnp.float32)
            acc_sc[...] = alpha * acc_sc[...] + jnp.dot(
                p.astype(v.dtype), v, preferred_element_type=jnp.float32)
            m_sc[...] = m_new
        return _accumulate

    if is_causal:
        q_lo = qi * tq
        q_hi = q_lo + (tq - 1)
        k_lo = ki * tk
        k_hi = k_lo + (tk - 1)
        # Fully below the diagonal -> no mask work at all.
        pl.when(k_hi <= q_lo)(_make_accumulate(False))
        # Intersects the diagonal -> masked path.
        pl.when(jnp.logical_and(k_lo <= q_hi, k_hi > q_lo))(_make_accumulate(True))
        # Fully above the diagonal -> nothing (and its KV block is not DMA'd:
        # the kv index_map clamps to the last needed tile, see wrapper).
    else:
        _make_accumulate(False)()

    @pl.when(ki == n_kv - 1)
    def _finalize():
        if o_ref.dtype == jnp.float32:
            inv_l = 1.0 / l_sc[...]                        # exact (strict f32 mode)
        else:
            inv_l = pl.reciprocal(l_sc[...], approx=True)  # EUP slot, nearly free
        o_ref[0] = (acc_sc[...] * inv_l).astype(o_ref.dtype)


# --------------------------------------------------------------------------
# Kernel 3: output projection attn @ Wo (written directly in the final dtype).
# --------------------------------------------------------------------------
def out_proj_kernel(a_ref, wo_ref, o_ref):
    o_ref[0] = jnp.dot(a_ref[0], wo_ref[...],
                       preferred_element_type=jnp.float32).astype(o_ref.dtype)


# --------------------------------------------------------------------------
# Wrapper.
# --------------------------------------------------------------------------
def _pick_tile(n, target, quantum):
    """Largest multiple of `quantum` dividing n that is <= target (else full n)."""
    t = min(target, max(n, 1))
    t -= t % quantum
    while t >= quantum:
        if n % t == 0:
            return t
        t -= quantum
    return n


def mqa_forward(x, Wq, Wk, Wv, Wo, freqs_cos, freqs_sin, is_causal=False,
                compute_dtype=jnp.bfloat16,
                seq_tile=None, q_tile=None, kv_tile=1024, proj_col_tile=None):
    """Returns (output (B,S,D) in x.dtype, (k_cache (B,1,S,Dh), v_cache (B,1,S,Dh)))."""
    B, S, D = x.shape
    Dh = Wk.shape[1]
    H = D // Dh
    assert D == H * Dh and Dh % 2 == 0

    cdt = jnp.dtype(compute_dtype)
    out_dt = x.dtype
    scale = 1.0 / math.sqrt(Dh)

    # ---- generation-aware budgets ---------------------------------------------
    vmem_cap = _vmem_capacity_bytes()
    vmem_limit = int(min(vmem_cap * 3 // 4, 96 * 1024 * 1024))  # ~96MiB v5e/v6e, 48MiB v7x
    budget = int(vmem_limit * 0.85)
    big_vmem = vmem_cap >= 100 * 1024 * 1024

    if seq_tile is None:
        seq_tile = 512 if big_vmem else 256
    if proj_col_tile is None:
        proj_col_tile = 1024 if big_vmem else 512
    if q_tile is None:
        q_tile = max(8, 512 // H)        # keeps the (tq*H, tk) score tile moderate

    ts = _pick_tile(S, seq_tile, 8)
    tq = _pick_tile(S, q_tile, 8)
    tk = _pick_tile(S, kv_tile, 8)
    lane_q = (Dh * 128) // math.gcd(Dh, 128)                 # lcm(Dh, 128)
    tdq = _pick_tile(D, max(proj_col_tile, lane_q), lane_q)  # Q-proj column slab
    tn = _pick_tile(D, max(proj_col_tile, 128), 128)         # Wo column slab

    itm = cdt.itemsize
    o_itm = jnp.dtype(out_dt).itemsize

    # Shrink projection tiles if the (double-buffered) working set exceeds the
    # per-generation VMEM budget (mainly a v7x / huge-D concern).
    def _k1_bytes(ts_, tdq_):
        ins = ts_ * D + D * tdq_ + D * 2 * Dh + 2 * ts_ * tdq_ + 2 * ts_ * Dh
        outs = ts_ * tdq_ + 2 * ts_ * Dh
        return 2 * (ins + outs) * itm

    for _ in range(16):
        if _k1_bytes(ts, tdq) <= budget:
            break
        if tdq // 2 >= lane_q:
            new = _pick_tile(D, tdq // 2, lane_q)
            if new < tdq:
                tdq = new
                continue
        if ts // 2 >= 8:
            new = _pick_tile(S, ts // 2, 8)
            if new < ts:
                ts = new
                continue
        break

    def _k3_bytes(ts_, tn_):
        return 2 * ((ts_ * D + D * tn_) * itm + ts_ * tn_ * o_itm)

    for _ in range(16):
        if _k3_bytes(ts, tn) <= budget:
            break
        if tn // 2 >= 128:
            new = _pick_tile(D, tn // 2, 128)
            if new < tn:
                tn = new
                continue
        if ts // 2 >= 8:
            new = _pick_tile(S, ts // 2, 8)
            if new < ts:
                ts = new
                continue
        break

    # bf16 softmax exponent only where the VPU/EUP handles bf16 (v6e / v7x).
    exp_dtype = (jnp.bfloat16
                 if (cdt == jnp.bfloat16 and _supports_bf16_vector_math())
                 else jnp.float32)

    # ---- RoPE tables (glue; stored in the compute dtype) ----------------------
    cos_pair = jnp.repeat(freqs_cos.astype(jnp.float32), 2, axis=-1)          # (S, Dh)
    sin_signed = jnp.stack([-freqs_sin, freqs_sin],
                           axis=-1).reshape(S, Dh).astype(jnp.float32)        # (S, Dh)
    gh = tdq // Dh
    cos_q = (jnp.tile(cos_pair, (1, gh)) * scale).astype(cdt)   # (S, tdq); scale folded
    sin_q = (jnp.tile(sin_signed, (1, gh)) * scale).astype(cdt)
    cos_k = cos_pair.astype(cdt)                                 # (S, Dh)
    sin_k = sin_signed.astype(cdt)

    x_c = x.astype(cdt)
    wq_c = Wq.astype(cdt)
    wkv_c = jnp.concatenate([Wk, Wv], axis=1).astype(cdt)        # (D, 2*Dh) packed
    wo_c = Wo.astype(cdt)

    # ---- kernel 1: QKV projection + RoPE --------------------------------------
    q_rot, k_rot, v_new = pl.pallas_call(
        qkv_rope_kernel,
        out_shape=(jax.ShapeDtypeStruct((B, S, D), cdt),
                   jax.ShapeDtypeStruct((B, S, Dh), cdt),
                   jax.ShapeDtypeStruct((B, S, Dh), cdt)),
        grid_spec=pltpu.PrefetchScalarGridSpec(
            num_scalar_prefetch=0,
            grid=(B, S // ts, D // tdq),
            in_specs=[
                pl.BlockSpec((1, ts, D), lambda b, s, d: (b, s, 0)),
                pl.BlockSpec((D, tdq), lambda b, s, d: (0, d)),
                pl.BlockSpec((D, 2 * Dh), lambda b, s, d: (0, 0)),
                pl.BlockSpec((ts, tdq), lambda b, s, d: (s, 0)),
                pl.BlockSpec((ts, tdq), lambda b, s, d: (s, 0)),
                pl.BlockSpec((ts, Dh), lambda b, s, d: (s, 0)),
                pl.BlockSpec((ts, Dh), lambda b, s, d: (s, 0)),
            ],
            out_specs=(
                pl.BlockSpec((1, ts, tdq), lambda b, s, d: (b, s, d)),
                pl.BlockSpec((1, ts, Dh), lambda b, s, d: (b, s, 0)),
                pl.BlockSpec((1, ts, Dh), lambda b, s, d: (b, s, 0)),
            ),
        ),
        compiler_params=pltpu.CompilerParams(
            dimension_semantics=("parallel", "parallel", "arbitrary"),
            vmem_limit_bytes=vmem_limit),
    )(x_c, wq_c, wkv_c, cos_q, sin_q, cos_k, sin_k)

    # Head-major flat view (free reshape): row s*H + h  <->  q_rot[s, h*Dh:(h+1)*Dh].
    q_hm = q_rot.reshape(B, S * H, Dh)

    # ---- kernel 2: flash MQA attention ----------------------------------------
    stat_w = 128 if Dh == 128 else 1     # lane-dense m/l scratch when possible

    if is_causal:
        # Clamp the kv block index to the last tile this qi actually needs, so
        # the pipeline never DMAs above-diagonal KV tiles (same index as the
        # previous step -> no copy is issued).
        def kv_idx(b, qi, ki):
            return (b, jnp.minimum(ki, (qi * tq + (tq - 1)) // tk), 0)
    else:
        def kv_idx(b, qi, ki):
            return (b, ki, 0)

    attn_hm = pl.pallas_call(
        functools.partial(mqa_attn_kernel, nhead=H, is_causal=is_causal,
                          exp_dtype=exp_dtype),
        out_shape=jax.ShapeDtypeStruct((B, S * H, Dh), cdt),
        grid_spec=pltpu.PrefetchScalarGridSpec(
            num_scalar_prefetch=0,
            grid=(B, S // tq, S // tk),
            in_specs=[
                pl.BlockSpec((1, tq * H, Dh), lambda b, qi, ki: (b, qi, 0)),
                pl.BlockSpec((1, tk, Dh), kv_idx),
                pl.BlockSpec((1, tk, Dh), kv_idx),
            ],
            out_specs=pl.BlockSpec((1, tq * H, Dh), lambda b, qi, ki: (b, qi, 0)),
            scratch_shapes=[
                pltpu.VMEM((tq * H, stat_w), jnp.float32),   # running max
                pltpu.VMEM((tq * H, stat_w), jnp.float32),   # running denom
                pltpu.VMEM((tq * H, Dh), jnp.float32),       # unnormalized output
            ],
        ),
        compiler_params=pltpu.CompilerParams(
            dimension_semantics=("parallel", "parallel", "arbitrary"),
            vmem_limit_bytes=vmem_limit),
    )(q_hm, k_rot, v_new)

    # Back to the interleaved (B, S, D) layout (free reshape), then Wo.
    attn = attn_hm.reshape(B, S, D)

    out = pl.pallas_call(
        out_proj_kernel,
        out_shape=jax.ShapeDtypeStruct((B, S, D), out_dt),
        grid_spec=pltpu.PrefetchScalarGridSpec(
            num_scalar_prefetch=0,
            grid=(B, S // ts, D // tn),
            in_specs=[
                pl.BlockSpec((1, ts, D), lambda b, s, n: (b, s, 0)),
                pl.BlockSpec((D, tn), lambda b, s, n: (0, n)),
            ],
            out_specs=pl.BlockSpec((1, ts, tn), lambda b, s, n: (b, s, n)),
        ),
        compiler_params=pltpu.CompilerParams(
            dimension_semantics=("parallel", "parallel", "parallel"),
            vmem_limit_bytes=vmem_limit),
    )(attn, wo_c)

    k_cache = k_rot[:, None].astype(x.dtype)     # (B,1,S,Dh)
    v_cache = v_new[:, None].astype(x.dtype)
    return out, (k_cache, v_cache)


# ---------------- pure-JAX reference (mirrors the torch module) ----------------
def _rope_ref(t, cos, sin):
    shp = t.shape
    half = shp[-1] // 2
    tr = t.reshape(*shp[:-1], half, 2)
    te, to = tr[..., 0], tr[..., 1]
    oe = te * cos - to * sin
    oo = te * sin + to * cos
    return jnp.stack([oe, oo], axis=-1).reshape(shp)


def ref_forward(x, Wq, Wk, Wv, Wo, cos, sin, is_causal):
    B, S, D = x.shape
    Dh = Wk.shape[1]
    H = D // Dh
    q = (x @ Wq).reshape(B, S, H, Dh)
    k = x @ Wk
    v = x @ Wv
    k_rot = _rope_ref(k, cos, sin)                                   # (B,S,Dh)
    q_rot = _rope_ref(q.transpose(0, 2, 1, 3).reshape(B * H, S, Dh), cos, sin)
    q_rot = q_rot.reshape(B, H, S, Dh)
    scores = jnp.einsum('bhqd,bkd->bhqk', q_rot, k_rot) / math.sqrt(Dh)
    if is_causal:
        mask = jnp.tril(jnp.ones((S, S), bool))
        scores = jnp.where(mask, scores, -jnp.inf)
    p = jax.nn.softmax(scores, axis=-1)
    attn = jnp.einsum('bhqk,bkd->bhqd', p, v)
    out = attn.transpose(0, 2, 1, 3).reshape(B, S, D) @ Wo
    return out, (k_rot[:, None], v[:, None])


if __name__ == "__main__":
    B, S, d_model, nhead = 2, 16, 32, 4
    Dh = d_model // nhead

    key = jax.random.PRNGKey(0)
    kx, kq, kk, kv, ko = jax.random.split(key, 5)
    x = jax.random.normal(kx, (B, S, d_model), jnp.float32)
    Wq = jax.random.normal(kq, (d_model, d_model), jnp.float32) * 0.05
    Wk = jax.random.normal(kk, (d_model, Dh), jnp.float32) * 0.05
    Wv = jax.random.normal(kv, (d_model, Dh), jnp.float32) * 0.05
    Wo = jax.random.normal(ko, (d_model, d_model), jnp.float32) * 0.05

    # RoPE frequencies: freqs_cis[s, i] = exp(1j * s * theta_i)
    inv_freq = 1.0 / (10000.0 ** (jnp.arange(0, Dh, 2, dtype=jnp.float32) / Dh))
    angles = jnp.arange(S, dtype=jnp.float32)[:, None] * inv_freq[None, :]
    freqs_cos, freqs_sin = jnp.cos(angles), jnp.sin(angles)          # (S, Dh//2)

    # f32 compute path (strict numerics).  Small tiles so the online-softmax
    # accumulation, causal tile-skip and multi-tile grids are all exercised.
    for causal in (True, False):
        out, (k_cache, v_cache) = mqa_forward(
            x, Wq, Wk, Wv, Wo, freqs_cos, freqs_sin, is_causal=causal,
            compute_dtype=jnp.float32, seq_tile=8, q_tile=8, kv_tile=8)
        jax.block_until_ready(out)
        jax.block_until_ready(k_cache)
        jax.block_until_ready(v_cache)
        out_ref, (k_ref, v_ref) = ref_forward(
            x, Wq, Wk, Wv, Wo, freqs_cos, freqs_sin, causal)
        assert out.shape == (B, S, d_model)
        assert k_cache.shape == (B, 1, S, Dh) and v_cache.shape == (B, 1, S, Dh)
        assert jnp.allclose(out, out_ref, rtol=5e-4, atol=5e-4), \
            f"f32 output mismatch (causal={causal})"
        assert jnp.allclose(k_cache, k_ref, rtol=5e-4, atol=5e-4), "f32 k cache mismatch"
        assert jnp.allclose(v_cache, v_ref, rtol=5e-4, atol=5e-4), "f32 v cache mismatch"

    # bf16 compute path (MXU-friendly production mode) -- looser tolerance.
    out16, (k16, v16) = mqa_forward(
        x, Wq, Wk, Wv, Wo, freqs_cos, freqs_sin, is_causal=True,
        compute_dtype=jnp.bfloat16, seq_tile=8, q_tile=8, kv_tile=8)
    jax.block_until_ready(out16)
    out_ref, (k_ref, v_ref) = ref_forward(
        x, Wq, Wk, Wv, Wo, freqs_cos, freqs_sin, True)
    assert jnp.allclose(out16, out_ref, rtol=5e-2, atol=5e-2), "bf16 output mismatch"
    assert jnp.allclose(k16, k_ref, rtol=5e-2, atol=5e-2), "bf16 k cache mismatch"
    assert jnp.allclose(v16, v_ref, rtol=5e-2, atol=5e-2), "bf16 v cache mismatch"

    print("KERNEL_OK")
</pallas_src>

<mosaic_0001>
module attributes {stable_mosaic.version = 11 : i64} {
  func.func @qkv_rope_kernel(%arg0: i32, %arg1: i32, %arg2: i32, %arg3: memref<1x8x32xf32, #tpu.memory_space<vmem>>, %arg4: memref<32x32xf32, #tpu.memory_space<vmem>>, %arg5: memref<32x16xf32, #tpu.memory_space<vmem>>, %arg6: memref<8x32xf32, #tpu.memory_space<vmem>>, %arg7: memref<8x32xf32, #tpu.memory_space<vmem>>, %arg8: memref<8x8xf32, #tpu.memory_space<vmem>>, %arg9: memref<8x8xf32, #tpu.memory_space<vmem>>, %arg10: memref<1x8x32xf32, #tpu.memory_space<vmem>>, %arg11: memref<1x8x8xf32, #tpu.memory_space<vmem>>, %arg12: memref<1x8x8xf32, #tpu.memory_space<vmem>>) attributes {dimension_semantics = [#tpu.dimension_semantics<parallel>, #tpu.dimension_semantics<parallel>, #tpu.dimension_semantics<arbitrary>], iteration_bounds = array<i64: 2, 2, 1>, scalar_prefetch = 0 : i64, scratch_operands = 0 : i64, tpu.core_type = #tpu.core_type<tc>, window_params = [{transform_indices = @transform_0, window_bounds = array<i64: 1, 8, 32>}, {transform_indices = @transform_1, window_bounds = array<i64: 32, 32>}, {pipeline_mode = #tpu.pipeline_mode<synchronous>, transform_indices = @transform_2, window_bounds = array<i64: 32, 16>}, {transform_indices = @transform_3, window_bounds = array<i64: 8, 32>}, {transform_indices = @transform_4, window_bounds = array<i64: 8, 32>}, {transform_indices = @transform_5, window_bounds = array<i64: 8, 8>}, {transform_indices = @transform_6, window_bounds = array<i64: 8, 8>}, {transform_indices = @transform_7, window_bounds = array<i64: 1, 8, 32>}, {transform_indices = @transform_8, window_bounds = array<i64: 1, 8, 8>}, {transform_indices = @transform_9, window_bounds = array<i64: 1, 8, 8>}]} {
    %c0 = arith.constant 0 : index
    %c0_0 = arith.constant 0 : index
    %c0_1 = arith.constant 0 : index
    %0 = vector.load %arg3[%c0, %c0_0, %c0_1] : memref<1x8x32xf32, #tpu.memory_space<vmem>>, vector<1x8x32xf32>
    %1 = vector.shape_cast %0 : vector<1x8x32xf32> to vector<8x32xf32>
    %c0_2 = arith.constant 0 : index
    %c0_3 = arith.constant 0 : index
    %2 = vector.load %arg4[%c0_2, %c0_3] : memref<32x32xf32, #tpu.memory_space<vmem>>, vector<32x32xf32>
    %cst = arith.constant dense<0.000000e+00> : vector<8x32xf32>
    %3 = tpu.matmul %1, %2, %cst {dimension_numbers = #tpu.dot_dimension_numbers<[1], [0], [0], [1], [0, 0, 1, 1], [], []>} : vector<8x32xf32>, vector<32x32xf32>, vector<8x32xf32> -> vector<8x32xf32>
    %4 = tpu.iota {dimensions = array<i32: 1>} : vector<8x32xi32>
    %c2_i32 = arith.constant 2 : i32
    %c0_i32 = arith.constant 0 : i32
    %5 = arith.cmpi eq, %c2_i32, %c0_i32 : i32
    %c1_i32 = arith.constant 1 : i32
    %6 = arith.select %5, %c1_i32, %c2_i32 : i32
    %7 = vector.broadcast %6 : i32 to vector<8x32xi32>
    %8 = arith.remsi %4, %7 : vector<8x32xi32>
    %c0_i32_4 = arith.constant 0 : i32
    %9 = vector.broadcast %c0_i32_4 : i32 to vector<8x32xi32>
    %10 = arith.cmpi ne, %8, %9 : vector<8x32xi32>
    %c0_i32_5 = arith.constant 0 : i32
    %11 = vector.broadcast %c0_i32_5 : i32 to vector<8x32xi32>
    %12 = arith.cmpi slt, %8, %11 : vector<8x32xi32>
    %c0_i32_6 = arith.constant 0 : i32
    %13 = arith.cmpi slt, %6, %c0_i32_6 : i32
    %14 = vector.broadcast %13 : i1 to vector<8x32xi1>
    %15 = vector.broadcast %14 : vector<8x32xi1> to vector<8x32xi1>
    %16 = arith.xori %12, %15 : vector<8x32xi1>
    %17 = arith.andi %16, %10 : vector<8x32xi1>
    %18 = vector.broadcast %6 : i32 to vector<8x32xi32>
    %19 = arith.addi %8, %18 : vector<8x32xi32>
    %20 = arith.select %17, %19, %8 : vector<8x32xi1>, vector<8x32xi32>
    %c0_i32_7 = arith.constant 0 : i32
    %21 = vector.broadcast %c0_i32_7 : i32 to vector<8x32xi32>
    %22 = arith.cmpi eq, %20, %21 : vector<8x32xi32>
    %c0_8 = arith.constant 0 : index
    %c0_9 = arith.constant 0 : index
    %23 = vector.load %arg6[%c0_8, %c0_9] : memref<8x32xf32, #tpu.memory_space<vmem>>, vector<8x32xf32>
    %c0_10 = arith.constant 0 : index
    %c0_11 = arith.constant 0 : index
    %24 = vector.load %arg7[%c0_10, %c0_11] : memref<8x32xf32, #tpu.memory_space<vmem>>, vector<8x32xf32>
    %25 = arith.mulf %3, %23 : vector<8x32xf32>
    %26 = vector.extract_strided_slice %3 {offsets = [0, 1], sizes = [8, 31], strides = [1, 1]} : vector<8x32xf32> to vector<8x31xf32>
    %27 = vector.extract_strided_slice %3 {offsets = [0, 0], sizes = [8, 1], strides = [1, 1]} : vector<8x32xf32> to vector<8x1xf32>
    %28 = tpu.concatenate %26, %27 in 1 : vector<8x31xf32>, vector<8x1xf32> -> vector<8x32xf32>
    %29 = vector.extract_strided_slice %3 {offsets = [0, 31], sizes = [8, 1], strides = [1, 1]} : vector<8x32xf32> to vector<8x1xf32>
    %30 = vector.extract_strided_slice %3 {offsets = [0, 0], sizes = [8, 31], strides = [1, 1]} : vector<8x32xf32> to vector<8x31xf32>
    %31 = tpu.concatenate %29, %30 in 1 : vector<8x1xf32>, vector<8x31xf32> -> vector<8x32xf32>
    %32 = arith.select %22, %28, %31 : vector<8x32xi1>, vector<8x32xf32>
    %33 = arith.mulf %32, %24 : vector<8x32xf32>
    %34 = arith.addf %25, %33 : vector<8x32xf32>
    %c0_12 = arith.constant 0 : index
    %c0_13 = arith.constant 0 : index
    %c0_14 = arith.constant 0 : index
    %35 = vector.load %arg10[%c0_12, %c0_13, %c0_14] : memref<1x8x32xf32, #tpu.memory_space<vmem>>, vector<1x8x32xf32>
    %36 = vector.shape_cast %35 : vector<1x8x32xf32> to vector<8x32xf32>
    %37 = vector.shape_cast %34 : vector<8x32xf32> to vector<1x8x32xf32>
    tpu.vector_store %arg10[%c0_12, %c0_13, %c0_14], %37 {strides = array<i32>} : memref<1x8x32xf32, #tpu.memory_space<vmem>>, vector<1x8x32xf32>,
    %c0_i32_15 = arith.constant 0 : i32
    %38 = arith.cmpi eq, %arg2, %c0_i32_15 : i32
    %39 = arith.extui %38 : i1 to i32
    %c0_i32_16 = arith.constant 0 : i32
    %40 = arith.cmpi ne, %39, %c0_i32_16 : i32
    scf.if %40 {
      %c0_17 = arith.constant 0 : index
      %c0_18 = arith.constant 0 : index
      %41 = vector.load %arg5[%c0_17, %c0_18] : memref<32x16xf32, #tpu.memory_space<vmem>>, vector<32x16xf32>
      %cst_19 = arith.constant dense<0.000000e+00> : vector<8x16xf32>
      %42 = tpu.matmul %1, %41, %cst_19 {dimension_numbers = #tpu.dot_dimension_numbers<[1], [0], [0], [1], [0, 0, 1, 1], [], []>} : vector<8x32xf32>, vector<32x16xf32>, vector<8x16xf32> -> vector<8x16xf32>
      %43 = vector.extract_strided_slice %42 {offsets = [0, 0], sizes = [8, 8], strides = [1, 1]} : vector<8x16xf32> to vector<8x8xf32>
      %44 = vector.extract_strided_slice %42 {offsets = [0, 8], sizes = [8, 8], strides = [1, 1]} : vector<8x16xf32> to vector<8x8xf32>
      %45 = tpu.iota {dimensions = array<i32: 1>} : vector<8x8xi32>
      %c2_i32_20 = arith.constant 2 : i32
      %c0_i32_21 = arith.constant 0 : i32
      %46 = arith.cmpi eq, %c2_i32_20, %c0_i32_21 : i32
      %c1_i32_22 = arith.constant 1 : i32
      %47 = arith.select %46, %c1_i32_22, %c2_i32_20 : i32
      %48 = vector.broadcast %47 : i32 to vector<8x8xi32>
      %49 = arith.remsi %45, %48 : vector<8x8xi32>
      %c0_i32_23 = arith.constant 0 : i32
      %50 = vector.broadcast %c0_i32_23 : i32 to vector<8x8xi32>
      %51 = arith.cmpi ne, %49, %50 : vector<8x8xi32>
      %c0_i32_24 = arith.constant 0 : i32
      %52 = vector.broadcast %c0_i32_24 : i32 to vector<8x8xi32>
      %53 = arith.cmpi slt, %49, %52 : vector<8x8xi32>
      %c0_i32_25 = arith.constant 0 : i32
      %54 = arith.cmpi slt, %47, %c0_i32_25 : i32
      %55 = vector.broadcast %54 : i1 to vector<8x8xi1>
      %56 = vector.broadcast %55 : vector<8x8xi1> to vector<8x8xi1>
      %57 = arith.xori %53, %56 : vector<8x8xi1>
      %58 = arith.andi %57, %51 : vector<8x8xi1>
      %59 = vector.broadcast %47 : i32 to vector<8x8xi32>
      %60 = arith.addi %49, %59 : vector<8x8xi32>
      %61 = arith.select %58, %60, %49 : vector<8x8xi1>, vector<8x8xi32>
      %c0_i32_26 = arith.constant 0 : i32
      %62 = vector.broadcast %c0_i32_26 : i32 to vector<8x8xi32>
      %63 = arith.cmpi eq, %61, %62 : vector<8x8xi32>
      %c0_27 = arith.constant 0 : index
      %c0_28 = arith.constant 0 : index
      %64 = vector.load %arg8[%c0_27, %c0_28] : memref<8x8xf32, #tpu.memory_space<vmem>>, vector<8x8xf32>
      %c0_29 = arith.constant 0 : index
      %c0_30 = arith.constant 0 : index
      %65 = vector.load %arg9[%c0_29, %c0_30] : memref<8x8xf32, #tpu.memory_space<vmem>>, vector<8x8xf32>
      %66 = arith.mulf %43, %64 : vector<8x8xf32>
      %67 = vector.extract_strided_slice %43 {offsets = [0, 1], sizes = [8, 7], strides = [1, 1]} : vector<8x8xf32> to vector<8x7xf32>
      %68 = vector.extract_strided_slice %43 {offsets = [0, 0], sizes = [8, 1], strides = [1, 1]} : vector<8x8xf32> to vector<8x1xf32>
      %69 = tpu.concatenate %67, %68 in 1 : vector<8x7xf32>, vector<8x1xf32> -> vector<8x8xf32>
      %70 = vector.extract_strided_slice %43 {offsets = [0, 7], sizes = [8, 1], strides = [1, 1]} : vector<8x8xf32> to vector<8x1xf32>
      %71 = vector.extract_strided_slice %43 {offsets = [0, 0], sizes = [8, 7], strides = [1, 1]} : vector<8x8xf32> to vector<8x7xf32>
      %72 = tpu.concatenate %70, %71 in 1 : vector<8x1xf32>, vector<8x7xf32> -> vector<8x8xf32>
      %73 = arith.select %63, %69, %72 : vector<8x8xi1>, vector<8x8xf32>
      %74 = arith.mulf %73, %65 : vector<8x8xf32>
      %75 = arith.addf %66, %74 : vector<8x8xf32>
      %c0_31 = arith.constant 0 : index
      %c0_32 = arith.constant 0 : index
      %c0_33 = arith.constant 0 : index
      %76 = vector.load %arg11[%c0_31, %c0_32, %c0_33] : memref<1x8x8xf32, #tpu.memory_space<vmem>>, vector<1x8x8xf32>
      %77 = vector.shape_cast %76 : vector<1x8x8xf32> to vector<8x8xf32>
      %78 = vector.shape_cast %75 : vector<8x8xf32> to vector<1x8x8xf32>
      tpu.vector_store %arg11[%c0_31, %c0_32, %c0_33], %78 {strides = array<i32>} : memref<1x8x8xf32, #tpu.memory_space<vmem>>, vector<1x8x8xf32>,
      %c0_34 = arith.constant 0 : index
      %c0_35 = arith.constant 0 : index
      %c0_36 = arith.constant 0 : index
      %79 = vector.load %arg12[%c0_34, %c0_35, %c0_36] : memref<1x8x8xf32, #tpu.memory_space<vmem>>, vector<1x8x8xf32>
      %80 = vector.shape_cast %79 : vector<1x8x8xf32> to vector<8x8xf32>
      %81 = vector.shape_cast %44 : vector<8x8xf32> to vector<1x8x8xf32>
      tpu.vector_store %arg12[%c0_34, %c0_35, %c0_36], %81 {strides = array<i32>} : memref<1x8x8xf32, #tpu.memory_space<vmem>>, vector<1x8x8xf32>,
    } else {
    }
    return
  }
  func.func @transform_0(%arg0: i32, %arg1: i32, %arg2: i32) -> (i32, i32, i32) {
    %c0_i32 = arith.constant 0 : i32
    %c0_i32_0 = arith.constant 0 : i32
    return %arg0, %arg1, %c0_i32 : i32, i32, i32
  }
  func.func @transform_1(%arg0: i32, %arg1: i32, %arg2: i32) -> (i32, i32) {
    %c0_i32 = arith.constant 0 : i32
    %c0_i32_0 = arith.constant 0 : i32
    return %c0_i32, %arg2 : i32, i32
  }
  func.func @transform_2(%arg0: i32, %arg1: i32, %arg2: i32) -> (i32, i32) {
    %c0_i32 = arith.constant 0 : i32
    %c0_i32_0 = arith.constant 0 : i32
    %c0_i32_1 = arith.constant 0 : i32
    return %c0_i32, %c0_i32_0 : i32, i32
  }
  func.func @transform_3(%arg0: i32, %arg1: i32, %arg2: i32) -> (i32, i32) {
    %c0_i32 = arith.constant 0 : i32
    %c0_i32_0 = arith.constant 0 : i32
    return %arg1, %c0_i32 : i32, i32
  }
  func.func @transform_4(%arg0: i32, %arg1: i32, %arg2: i32) -> (i32, i32) {
    %c0_i32 = arith.constant 0 : i32
    %c0_i32_0 = arith.constant 0 : i32
    return %arg1, %c0_i32 : i32, i32
  }
  func.func @transform_5(%arg0: i32, %arg1: i32, %arg2: i32) -> (i32, i32) {
    %c0_i32 = arith.constant 0 : i32
    %c0_i32_0 = arith.constant 0 : i32
    return %arg1, %c0_i32 : i32, i32
  }
  func.func @transform_6(%arg0: i32, %arg1: i32, %arg2: i32) -> (i32, i32) {
    %c0_i32 = arith.constant 0 : i32
    %c0_i32_0 = arith.constant 0 : i32
    return %arg1, %c0_i32 : i32, i32
  }
  func.func @transform_7(%arg0: i32, %arg1: i32, %arg2: i32) -> (i32, i32, i32) {
    %c0_i32 = arith.constant 0 : i32
    return %arg0, %arg1, %arg2 : i32, i32, i32
  }
  func.func @transform_8(%arg0: i32, %arg1: i32, %arg2: i32) -> (i32, i32, i32) {
    %c0_i32 = arith.constant 0 : i32
    %c0_i32_0 = arith.constant 0 : i32
    return %arg0, %arg1, %c0_i32 : i32, i32, i32
  }
  func.func @transform_9(%arg0: i32, %arg1: i32, %arg2: i32) -> (i32, i32, i32) {
    %c0_i32 = arith.constant 0 : i32
    %c0_i32_0 = arith.constant 0 : i32
    return %arg0, %arg1, %c0_i32 : i32, i32, i32
  }
}

</mosaic_0001>

<bundles_post_ra>
// kernel: tpu_custom_call.1
= control target key start
LH: loop header
LB: loop body
LE: loop exit
PB: predicated region body
PF: predicated region fallthrough
CT: control target
= control target key end

     0   :  { %s1473_s0 = inlined_call_operand.vmem [shape: f32[2,16,32], index: 0, kind: input, shape index: {}]   ;;  %s1474_s1 = inlined_call_operand.vmem [shape: f32[32,32], index: 1, kind: input, shape index: {}]   ;;  %s1475_s2 = inlined_call_operand.vmem [shape: f32[32,16], index: 2, kind: input, shape index: {}]   ;;  %s1476_s3 = inlined_call_operand.vmem [shape: f32[16,32], index: 3, kind: input, shape index: {}]   ;;  %s1477_s4 = inlined_call_operand.vmem [shape: f32[16,32], index: 4, kind: input, shape index: {}]   ;;  %s1478_s5 = inlined_call_operand.vmem [shape: f32[16,8], index: 5, kind: input, shape index: {}]   ;;  %s1479_s6 = inlined_call_operand.vmem [shape: f32[16,8], index: 6, kind: input, shape index: {}]   ;;  %s1480_s7 = inlined_call_operand.hbm [shape: f32[2,16,32], index: 7, kind: output, shape index: {0}]   ;;  %s1481_s8 = inlined_call_operand.vmem [shape: f32[2,16,8], index: 8, kind: output, shape index: {1}]   ;;  %s1482_s9 = inlined_call_operand.vmem [shape: f32[2,16,8], index: 9, kind: output, shape index: {2}]  }
   0x1   :  { %1486 = sst [smem:[#allocation8_spill]] %s1473_s0 }
   0x2   :  { %15 = vsyncpa [#allocation3], 0 }
   0x3   :  { %17 = vsyncpa [#allocation3 + $0x1], 0  ;;  %s1261_s30 = smov 0   ;;  %s1263_s10 = smov 0  }
   0x4   :  { %s1265_s11 = smov 0   ;;  %s1267_s12 = smov 0  }
   0x5   :  { %s1269_s13 = smov 0   ;;  %s1271_s14 = smov 0  }
   0x6   :  { %s1273_s15 = smov 0   ;;  %s1275_s16 = smov 0  }
   0x7 LB: > { %1487 = sst [smem:[#allocation5_spill]] %s1195_s15  ;;  %s971_s17 = sadd.s32 4294967295, %s1199_s16   ;;  %s1199_s16 = sphi %s1275_s16, %s23_s16   ;;  %s1195_s15 = sphi %s1273_s15, %s1497_s15   ;;  %s1191_s14 = sphi %s1271_s14, %s1502_s14   ;;  %s1187_s13 = sphi %s1269_s13, %s1495_s13   ;;  %s1183_s12 = sphi %s1267_s12, %s1501_s12   ;;  %s1179_s11 = sphi %s1265_s11, %s1500_s11   ;;  %s1175_s10 = sphi %s1263_s10, %s1499_s10   ;;  %s1171_s30 = sphi %s1261_s30, %s1498_s30  }
   0x8   : > { %s972_s18 = sadd.s32 4294967294, %s1199_s16   ;;  %s38_s19 = sadd.s32 1, %s1191_s14 }
   0x9   : > { %p40_p0 = scmp.ge.s32.totalorder %s38_s19, 2  ;;  %s42_s20 = sadd.s32 1, %s1195_s15 }
   0xa   : > { %p242_p1 = scmp.ne.s32.totalorder %s1179_s11, %s1175_s10  ;;  %p243_p2 = scmp.eq.s32.totalorder %s971_s17, 3 }
   0xb   : > { %s1504_s19 = smov (%p40_p0, %s38_s19), 0  ;;  %s1506_s20 = smov (!%p40_p0, %s42_s20), %s1195_s15 }
   0xc   : > { %1488 = sst [smem:[#allocation6_spill]] %s1504_s19  ;;  %s226_s21 = ssub.s32 %s1191_s14, %s1504_s19 }
   0xd   : > { %p1312_p3 = por %p243_p2, %p242_p1  ;;  %p44_p4 = scmp.ge.s32.totalorder %s1506_s20, 2 }
   0xe   : > { %p248_p5 = scmp.ne.s32.totalorder %s1175_s10, %s1171_s30  ;;  %p249_p6 = scmp.eq.s32.totalorder %s972_s18, 3 }
   0xf   : > { %p976_p7 = scmp.ge.s32.totalorder %s1199_s16, 1  ;;  %s1508_s20 = smov (%p44_p4, %s1506_s20), 0 }
  0x10   : > { %1490 = sst [smem:[#allocation7_spill]] %s1508_s20  ;;  %p1321_p8 = por %p249_p6, %p248_p5 }
  0x11   : > { %p372_p9 = scmp.lt.s32.totalorder %s1199_s16, 5  ;;  %s225_s24 = ssub.s32 %s1195_s15, %s1508_s20 }
  0x12   : > { %s232_s25 = sadd.s32 1, %s1179_s11  ;;  %s227_s26 = sor.u32 %s226_s21, %s225_s24 }
  0x13   : > { %p373_p10 = pnand %p976_p7, %p372_p9  ;;  %p230_p11 = scmp.eq.s32.totalorder %s227_s26, 0 }
  0x14   : > { %p447_p12 = scmp.lt.s32.totalorder (!%p373_p10), %s1187_s13, 1  ;;  %p449_p13 = scmp.lt.s32.totalorder (!%p373_p10), %s1183_s12, 1 }
  0x15   : > { %s1330_s27 = scalar_select %p230_p11, %s1179_s11, %s232_s25  }
  0x16   : > { %376 = sbr.rel (%p373_p10) target bundleno = 374 (0x176), region = 48  ;;  %s1492_s0 = sld [smem:[#allocation8_spill]] (!%p373_p10) }
  0x17   : > { %s1203_s21 = smov (!%p373_p10), 97   ;;  %s1206_s19 = smov (!%p373_p10), 31  }
  0x18   : > { %s1209_s20 = smov (!%p373_p10), 120  }
  0x1b   : > { %v495_v0 = vld [vmem:[%s1474_s1 + $0x18] sm:$0xff]  ;;  %v1201_v1 = vmov 0.0   ;;  %v494_v2 = vld [vmem:[%s1474_s1 + $0x10] sm:$0xff]  ;;  %vm1202_vm0 = vmmov 0   ;;  %s448_s25 = scalar_select %p447_p12, %s1187_s13, 1  ;;  %v493_v5 = vld [vmem:[%s1474_s1 + $0x8] sm:$0xff]  ;;  %v570_v18 = vlaneseq }
  0x1c   : > { %1005 = vmatprep.subr.mxu0 %v1201_v1  ;;  %1016 = vmatprep.subr.mxu1 %v1201_v1  ;;  %v616_v3 = vld [vmem:[%s1475_s2 + $0x18] sm:$0xff]  ;;  %v615_v4 = vld [vmem:[%s1475_s2 + $0x10] sm:$0xff]  ;;  %s450_s17 = scalar_select %p449_p13, %s1183_s12, 1  ;;  %v614_v6 = vld [vmem:[%s1475_s2 + $0x8] sm:$0xff]  ;;  %vm496_vm1 = vcmask 261120   ;;  %vm603_vm2 = vcmask 7168  }
  0x1d   : > { %1006 = vmatpush3.msra.mxu0 %v495_v0  ;;  %1013 = vmatprep.mubr.msk.f32.mxu0 %vm1202_vm0, %v1201_v1  ;;  %s978_s18 = sshll.u32 %s448_s25, 1  ;;  %v492_v7 = vld [vmem:[%s1474_s1] sm:$0xff]  ;;  %v571_v19 = vand.u32 127, %v570_v18  ;;  %s424_s25 = sand.u32 1, %s1175_s10   ;;  %vm595_vm3 = vcmask 252928   ;;  %vm697_vm5 = vcmask 56320  }
  0x1e   : > { %1007 = vmatprep.subr.mxu0 %v1201_v1  ;;  %1017 = vmatpush3.msra.mxu1 %v616_v3  ;;  %s452_s26 = sadd.s32 %s978_s18, %s450_s17  ;;  %v613_v8 = vld [vmem:[%s1475_s2] sm:$0xff]  ;;  %s1370_s15 = sshll.u32 %s450_s17, 3 }
  0x1f   : > { %1008 = vmatpush3.msra.mxu0 %v494_v2  ;;  %1018 = vmatprep.subr.mxu1 %v1201_v1  ;;  %s1358_s28 = sshll.u32 %s452_s26, 3  ;;  %s462_s26 = scalar_lea.vmem %s1476_s3, %s1370_s15  ;;  %v576_v20 = vand.u32 1, %v571_v19 }
  0x20   : > { %1009 = vmatprep.subr.mxu0 %v1201_v1  ;;  %1019 = vmatpush3.msra.mxu1 %v615_v4  ;;  %s454_s24 = scalar_lea.vmem %s1492_s0, %s1358_s28  ;;  %s470_s29 = scalar_lea.vmem %s1478_s5, %s1370_s15  ;;  %v585_v10 = vld [vmem:[%s462_s26] sm:$0xff] }
  0x21   : > { %1010 = vmatpush3.msra.mxu0 %v493_v5  ;;  %1020 = vmatprep.subr.mxu1 %v1201_v1  ;;  %v491_v9 = vld [vmem:[%s454_s24] sm:$0xff]  ;;  %s1204_s24 = smov 127   ;;  %s1205_s17 = smov 1   ;;  %vm1390_vm4 = vcmp.eq.s32.totalorder %v576_v20, 0 }
  0x22   : > { %1011 = vmatprep.subr.mxu0 %v1201_v1  ;;  %1021 = vmatpush3.msra.mxu1 %v614_v6  ;;  %v687_v12 = vld [vmem:[%s470_s29] sm:$0xff]  ;;  %s1207_s18 = smov 7   ;;  %s1208_s26 = smov 121  }
  0x23   : > { %1012 = vmatpush3.msra.mxu0 %v492_v7  ;;  %1022 = vmatprep.subr.mxu1 %v1201_v1  ;;  %s991_s29 = sshll.u32 %s1187_s13, 1  ;;  %s466_s0 = scalar_lea.vmem %s1477_s4, %s1370_s15 }
  0x24   : > { %1014 = vmatmul.mubr.msk.f32.vlgmr.msra.gmra.mxu0 %vm496_vm1, %v491_v9  ;;  %1023 = vmatpush3.msra.mxu1 %v613_v8  ;;  %v586_v25 = vld [vmem:[%s466_s0] sm:$0xff] }
  0x25   : > { %1024 = vmatprep.mubr.msk.f32.mxu1 %vm1202_vm0, %v1201_v1 }
  0x26   : > { %1025 = vmatmul.mubr.msk.f32.vlgmr.msra.gmra.mxu1 %vm496_vm1, %v491_v9 }
  0xe4   : > { %v566_v11 = vpop.f32.mrf.mxu0 }
  0xe5   : > { %v587_v13 = vmul.f32 %v585_v10, %v566_v11  ;;  %597 = vrot.lane.b32.xlu1 %v566_v11, %s1203_s21  ;;  %589 = vrot.lane.b32.xlu0 %v566_v11, %s1204_s24 }
  0xe6   : > { %v1015_v14 = vpop.f32.mrf.mxu0  ;;  %v683_v15 = vpop.f32.mrf.mxu1 }
  0xe7   : > { %v1380_v16 = vmul.f32 %v687_v12, %v683_v15 }
  0xe8   : > { %v1026_v17 = vpop.f32.mrf.mxu1 }
  0xe9   : > { %600 = vrot.lane.b32.xlu1 %v566_v11, %s1205_s17  ;;  %592 = vrot.lane.b32.xlu0 %v566_v11, %s1206_s19 }
  0xed   : > { %694 = vrot.lane.b32.xlu1 %v683_v15, %s1207_s18  ;;  %691 = vrot.lane.b32.xlu0 %v683_v15, %s1204_s24  ;;  %s977_s24 = sshll.u32 %s424_s25, 3 }
  0xee   : > { %s426_s18 = scalar_lea.vmem [#allocation2], %s977_s24  ;;  %s716_s24 = scalar_lea.sflag [#allocation3], %s424_s25 }
  0xf1   : > { %702 = vrot.lane.b32.xlu1 %v683_v15, %s1205_s17  ;;  %699 = vrot.lane.b32.xlu0 %v683_v15, %s1208_s26  ;;  %s744_s17 = sadd.s32 %s1183_s12, %s991_s29  ;;  %s748_s26 = sshll.u32 %s426_s18, 4  ;;  %s1407_s26 = int_to_ptr.vmem [resolvable:$true] %s748_s26 }
  0xf2   : > { %s992_s13 = sshll.u32 %s744_s17, 7  ;;  %s474_s12 = scalar_lea.vmem %s1479_s6, %s1370_s15 }
  0xf3   : > { %s1405_s19 = scalar_lea.hbm %s1480_s7, %s992_s13  ;;  %v688_v35 = vld [vmem:[%s474_s12] sm:$0xff]  ;;  %s1107_s15 = scalar_lea.vmem %s1407_s26, 128 }
  0xf4   : > { %p1108_p0 = scmp.ne.s32.totalorder %s1407_s26, %s1107_s15  ;;  %s1210_s17 = smov [#allocation2]  }
  0xf5   : > { %711 = vrot.lane.b32.xlu0 %v683_v15, %s1209_s20  ;;  %s1111_s13 = sshll.u32 %s1210_s17, 4  ;;  %s1112_s13 = int_to_ptr.vmem [resolvable:$false] %s1111_s13 }
  0xf6   : > { %p1109_p1 = pnand %p1108_p0, %p1312_p3  ;;  %s1113_s20 = scalar_lea.vmem %s1112_s13, 256 }
  0xf7   : > { %p1114_p4 = scmp.lt.s32.totalorder %s1407_s26, %s1112_s13  ;;  %p1115_p5 = scmp.lt.s32.totalorder %s1113_s20, %s1107_s15 }
  0xf8   : > { %p1110_p2 = pneg %p1109_p1 }
  0xf9   : > { %p1116_p6 = por %p1115_p5, %p1114_p4 }
  0xfb   : > { %p1117_p7 = pnand %p1116_p6, %p1110_p2 }
 0x157   : > { %v598_v21 = vpop.permute.xlu1 %597  ;;  %v590_v22 = vpop.permute.xlu0 %589 }
 0x15b   : > { %v601_v24 = vpop.permute.xlu1 %600  ;;  %v593_v26 = vpop.permute.xlu0 %592 }
 0x15c   : > { %v604_v27 = vsel %vm603_vm2, %v598_v21, %v601_v24  ;;  %v596_v28 = vsel %vm595_vm3, %v590_v22, %v593_v26 }
 0x15d   : > { %v605_v29 = vsel %vm1390_vm4, %v596_v28, %v604_v27 }
 0x15e   : > { %v606_v30 = vmul.f32 %v605_v29, %v586_v25 }
 0x15f   : > { %v695_v31 = vpop.permute.xlu1 %694  ;;  %v692_v32 = vpop.permute.xlu0 %691 }
 0x160   : > { %v607_v33 = vadd.f32 %v606_v30, %v587_v13 }
 0x162   : > { %608 = vst.msk [vmem:[%s426_s18] sm:$0xff] %vm496_vm1, %v607_v33 }
 0x163   : > { %v703_v34 = vpop.permute.xlu1 %702  ;;  %v700_v36 = vpop.permute.xlu0 %699 }
 0x164   : > { %1120 = shalt.err (!%p1117_p7)
}
 0x165   : > { %s1121_s18 = scalar_lea.hbm %s1405_s19, 128  ;;  %s1125_s12 = scalar_lea.hbm %s1480_s7, 512 }
 0x166   : > { %p1122_p9 = scmp.ne.s32.totalorder %s1405_s19, %s1121_s18  ;;  %p1126_p12 = scmp.lt.s32.totalorder %s1405_s19, %s1480_s7 }
 0x167   : > { %p1127_p13 = scmp.lt.s32.totalorder %s1125_s12, %s1121_s18 }
 0x168   : > { %p1123_p10 = pnand %p1122_p9, %p1312_p3 }
 0x169   : > { %p1128_p0 = por %p1127_p13, %p1126_p12 }
 0x16a   : > { %p1124_p11 = pneg %p1123_p10 }
 0x16c   : > { %p1129_p1 = pnand %p1128_p0, %p1124_p11 }
 0x16e   : > { %1132 = shalt.err (!%p1129_p1)
}
 0x16f   : > { %1027 = dma.vmem_to_hbm [thread:$0]  (%p1312_p3), %s1407_s26, 128, %s1405_s19, %s716_s24   ;;  %v698_v37 = vsel %vm697_vm5, %v692_v32, %v695_v31  ;;  %v705_v38 = vsel %vm603_vm2, %v700_v36, %v703_v34  ;;  %vm709_vm6 = vcmask 64512   ;;  %v712_v41 = vpop.permute.xlu0 %711 }
 0x170   : > { %v706_v39 = vsel %vm1390_vm4, %v698_v37, %v705_v38  ;;  %s490_s13 = scalar_lea.vmem %s1482_s9, %s1358_s28  ;;  %s482_s18 = scalar_lea.vmem %s1481_s8, %s1358_s28 }
 0x171   : > { %v707_v40 = vmul.f32 %v706_v39, %v688_v35  ;;  %714 = vst.msk [vmem:[%s490_s13] sm:$0xff] %vm709_vm6, %v712_v41 }
 0x173   : > { %v708_v42 = vadd.f32 %v707_v40, %v1380_v16 }
 0x175   : > { %710 = vst.msk [vmem:[%s482_s18] sm:$0xff] %vm709_vm6, %v708_v42 }
 0x176 PF: > { %p1033_p3 = scmp.ge.s32.totalorder %s1199_s16, 2  ;;  %s766_s26 = sand.u32 1, %s1171_s30  }
 0x177   : > { %s767_s19 = scalar_lea.sflag [#allocation3], %s766_s26 }
 0x178   : > { %p1030_p2 = pnand %p1033_p3, %p1321_p8 }
 0x17a   : > { %p1031_p4 = pneg %p1030_p2 }
 0x17c   : > { %1166 = dma.done.wait (%p1031_p4), %s767_s19, 128  }
 0x17d   : > { %1168 = vsyncadd (%p1031_p4), %s767_s19, 4294967168  ;;  %s23_s16 = sadd.s32 1, %s1199_s16   ;;  %s1495_s13 = sld [smem:[#allocation5_spill]] }
 0x17e   : > { %p20_p5 = scmp.ge.s32.totalorder %s23_s16, 6   ;;  %s1496_s28 = sld [smem:[#allocation6_spill]] }
 0x17f   : > { %s1497_s15 = sld [smem:[#allocation7_spill]]  ;;  %s1498_s30 = smov %s1175_s10 }
 0x180   : > { %s1499_s10 = smov %s1179_s11  ;;  %s1500_s11 = smov %s1330_s27 }
 0x181   : > { %s1501_s12 = smov %s1191_s14  ;;  %22 = sbr.rel (!%p20_p5) target bundleno = 7 (0x7), region = 126 }
 0x184   : > { %s1502_s14 = smov %s1496_s28 }
 0x186   :  { %794 = vsyncpa [#allocation3], 1 }
 0x187   :  { %796 = vsyncpa [#allocation3 + $0x1], 1 }

</bundles_post_ra>
